<compile_context>
chip_gen: v6e
topology: v6e:2x2x1
jax: 0.10.0
libtpu: 0.0.40
codegen_flags: <defaults>
</compile_context>

<pallas_src>
import jax
import jax.numpy as jnp
from jax.experimental import pallas as pl
from jax.experimental.pallas import tpu as pltpu


def salhead_kernel(w_ref, b_ref, x_ref, o_ref):
    # w_ref: VMEM (1, C, 1, 1) f32; b_ref: SMEM (1,) f32
    # x_ref: VMEM (TN, C, T8, 128); o_ref: VMEM (TN, T8, 128)
    x = x_ref[...].astype(jnp.float32)            # dense (TN, C, T8, 128) tiles
    w = w_ref[...].astype(jnp.float32)            # (1, C, 1, 1), broadcasts on VPU
    acc = jnp.sum(x * w, axis=1)                  # leading-axis reduce -> (TN, T8, 128)
    o_ref[...] = (acc + b_ref[0]).astype(o_ref.dtype)


def _largest_divisor_at_most(n, cap):
    cap = max(1, min(n, cap))
    for d in range(cap, 0, -1):
        if n % d == 0:
            return d
    return 1


def _pick_tiles(N, C, P, itemsize, target_block_bytes):
    """Choose (TN, T8): images per block and spatial 128-lane rows per block."""
    bytes_per_prow = C * 128 * itemsize           # one spatial row (all channels, one image)

    # Spatial tile: multiple of 8 sublanes, or the full P when P is small.
    if P <= 8:
        T8 = P                                    # block dim == full array dim is legal
    else:
        budget_rows = max(8, int(target_block_bytes // bytes_per_prow))
        T8 = min(P, (budget_rows // 8) * 8)
        T8 = max(T8, 8)

    # Images per block: fill the byte budget (helps small feature maps), but
    # keep TN a divisor of N so no leading-dim block is ragged.
    block_bytes_one = C * T8 * 128 * itemsize
    tn_cap = max(1, int(target_block_bytes // max(block_bytes_one, 1)))
    TN = _largest_divisor_at_most(N, tn_cap)

    # v7x has 2 TensorCores: ensure >= 2 parallel grid steps when possible.
    def steps(tn, t8):
        return pl.cdiv(N, tn) * pl.cdiv(P, t8)

    if steps(TN, T8) < 2:
        if N >= 2:
            TN = _largest_divisor_at_most(N, max(1, (N + 1) // 2))
        elif P > 8:
            T8 = max(8, ((T8 // 2) // 8) * 8)
    return TN, T8


def sal_head(x, weight, bias, *, target_block_bytes=6 << 20, vmem_limit_bytes=48 << 20):
    """x: (N, C, H, W); weight: (1, C, 1, 1); bias: (1,). Returns (N, 1, H, W)."""
    N, C, H, W = x.shape
    HW = H * W
    P = pl.cdiv(HW, 128)
    HW_pad = P * 128
    itemsize = x.dtype.itemsize

    # Lane-dense layout: (N, C, P, 128).  Pad HW up to a multiple of 128 if
    # needed (per-pixel math, so padded pixels are simply trimmed afterwards).
    x3 = x.reshape(N, C, HW)
    if HW_pad != HW:
        x3 = jnp.pad(x3, ((0, 0), (0, 0), (0, HW_pad - HW)))
    x4 = x3.reshape(N, C, P, 128)

    w4 = weight.reshape(1, C, 1, 1).astype(jnp.float32)   # tiny VMEM-resident weight
    b1 = bias.reshape(1).astype(jnp.float32)              # scalar -> SMEM

    TN, T8 = _pick_tiles(N, C, P, itemsize, target_block_bytes)
    grid = (pl.cdiv(N, TN), pl.cdiv(P, T8))
    # Ragged last spatial block (T8 not dividing P) is safe: the math is purely
    # per-element, OOB output rows are dropped by Pallas.

    cost = pl.CostEstimate(
        flops=2 * N * C * HW_pad,
        transcendentals=0,
        bytes_accessed=N * C * HW_pad * itemsize + N * HW_pad * itemsize + (C + 1) * 4,
    )

    out3 = pl.pallas_call(
        salhead_kernel,
        out_shape=jax.ShapeDtypeStruct((N, P, 128), x.dtype),
        grid_spec=pltpu.PrefetchScalarGridSpec(
            num_scalar_prefetch=0,
            grid=grid,
            in_specs=[
                # Conv weight: full (1, C, 1, 1) block, resident across the grid.
                pl.BlockSpec((1, C, 1, 1), lambda n, t: (0, 0, 0, 0)),
                # Bias scalar in SMEM.
                pl.BlockSpec(memory_space=pltpu.MemorySpace.SMEM),
                # Streaming input slab: (TN, C, T8, 128).
                pl.BlockSpec((TN, C, T8, 128), lambda n, t: (n, 0, t, 0)),
            ],
            out_specs=pl.BlockSpec((TN, T8, 128), lambda n, t: (n, t, 0)),
        ),
        compiler_params=pltpu.CompilerParams(
            dimension_semantics=("parallel", "parallel"),
            vmem_limit_bytes=vmem_limit_bytes,
        ),
        cost_estimate=cost,
    )(w4, b1, x4)

    out = out3.reshape(N, HW_pad)[:, :HW].reshape(N, 1, H, W)
    return out


if __name__ == "__main__":
    key = jax.random.PRNGKey(0)
    kx, kw, kb = jax.random.split(key, 3)

    N, C, H, W = 2, 4, 16, 16  # batch=2, in_channel=4, spatial=16x16
    x = jax.random.normal(kx, (N, C, H, W), dtype=jnp.float32)

    # Deterministic parameter init (shapes from nn.Conv2d(in_channel, 1, 1)).
    weight = jax.random.normal(kw, (1, C, 1, 1), dtype=jnp.float32) * 0.1
    bias = jax.random.normal(kb, (1,), dtype=jnp.float32) * 0.1

    out = sal_head(x, weight, bias)
    out = jax.block_until_ready(out)

    # Reference check (pure JAX 1x1 conv; Dropout2d is identity at inference).
    ref = jnp.einsum("nchw,c->nhw", x, weight.reshape(C)) + bias[0]
    ref = ref[:, None, :, :]
    assert out.shape == (N, 1, H, W)
    assert jnp.allclose(out, ref, atol=1e-5, rtol=1e-5)

    print("KERNEL_OK")
</pallas_src>

<mosaic_0001>
module attributes {stable_mosaic.version = 11 : i64} {
  func.func @salhead_kernel(%arg0: i32, %arg1: i32, %arg2: memref<1x4x1x1xf32, #tpu.memory_space<vmem>>, %arg3: memref<1xf32, #tpu.memory_space<smem>>, %arg4: memref<1x4x2x128xf32, #tpu.memory_space<vmem>>, %arg5: memref<1x2x128xf32, #tpu.memory_space<vmem>>) attributes {dimension_semantics = [#tpu.dimension_semantics<parallel>, #tpu.dimension_semantics<parallel>], iteration_bounds = array<i64: 2, 1>, scalar_prefetch = 0 : i64, scratch_operands = 0 : i64, tpu.core_type = #tpu.core_type<tc>, window_params = [{pipeline_mode = #tpu.pipeline_mode<synchronous>, transform_indices = @transform_0, window_bounds = array<i64: 1, 4, 1, 1>}, {transform_indices = @transform_1, window_bounds = array<i64: 1>}, {transform_indices = @transform_2, window_bounds = array<i64: 1, 4, 2, 128>}, {transform_indices = @transform_3, window_bounds = array<i64: 1, 2, 128>}]} {
    %c0 = arith.constant 0 : index
    %c0_0 = arith.constant 0 : index
    %c0_1 = arith.constant 0 : index
    %c0_2 = arith.constant 0 : index
    %0 = vector.load %arg4[%c0, %c0_0, %c0_1, %c0_2] : memref<1x4x2x128xf32, #tpu.memory_space<vmem>>, vector<1x4x2x128xf32>
    %c0_3 = arith.constant 0 : index
    %c0_4 = arith.constant 0 : index
    %c0_5 = arith.constant 0 : index
    %c0_6 = arith.constant 0 : index
    %1 = vector.load %arg2[%c0_3, %c0_4, %c0_5, %c0_6] : memref<1x4x1x1xf32, #tpu.memory_space<vmem>>, vector<1x4x1x1xf32>
    %2 = vector.broadcast %1 : vector<1x4x1x1xf32> to vector<1x4x2x128xf32>
    %3 = arith.mulf %0, %2 : vector<1x4x2x128xf32>
    %cst = arith.constant dense<0.000000e+00> : vector<1x2x128xf32>
    %4 = vector.multi_reduction <add>, %3, %cst [1] : vector<1x4x2x128xf32> to vector<1x2x128xf32>
    %c0_7 = arith.constant 0 : index
    %5 = memref.load %arg3[%c0_7] : memref<1xf32, #tpu.memory_space<smem>>
    %6 = vector.broadcast %5 : f32 to vector<1x2x128xf32>
    %7 = arith.addf %4, %6 : vector<1x2x128xf32>
    %c0_8 = arith.constant 0 : index
    %c0_9 = arith.constant 0 : index
    %c0_10 = arith.constant 0 : index
    %8 = vector.load %arg5[%c0_8, %c0_9, %c0_10] : memref<1x2x128xf32, #tpu.memory_space<vmem>>, vector<1x2x128xf32>
    tpu.vector_store %arg5[%c0_8, %c0_9, %c0_10], %7 {strides = array<i32>} : memref<1x2x128xf32, #tpu.memory_space<vmem>>, vector<1x2x128xf32>,
    return
  }
  func.func @transform_0(%arg0: i32, %arg1: i32) -> (i32, i32, i32, i32) {
    %c0_i32 = arith.constant 0 : i32
    %c0_i32_0 = arith.constant 0 : i32
    %c0_i32_1 = arith.constant 0 : i32
    %c0_i32_2 = arith.constant 0 : i32
    %c0_i32_3 = arith.constant 0 : i32
    return %c0_i32, %c0_i32_0, %c0_i32_1, %c0_i32_2 : i32, i32, i32, i32
  }
  func.func @transform_1(%arg0: i32, %arg1: i32) -> i32 {
    %c0_i32 = arith.constant 0 : i32
    %c0_i32_0 = arith.constant 0 : i32
    return %c0_i32 : i32
  }
  func.func @transform_2(%arg0: i32, %arg1: i32) -> (i32, i32, i32, i32) {
    %c0_i32 = arith.constant 0 : i32
    %c0_i32_0 = arith.constant 0 : i32
    %c0_i32_1 = arith.constant 0 : i32
    return %arg0, %c0_i32, %arg1, %c0_i32_0 : i32, i32, i32, i32
  }
  func.func @transform_3(%arg0: i32, %arg1: i32) -> (i32, i32, i32) {
    %c0_i32 = arith.constant 0 : i32
    %c0_i32_0 = arith.constant 0 : i32
    return %arg0, %arg1, %c0_i32 : i32, i32, i32
  }
}

</mosaic_0001>

<bundles_post_ra>
// kernel: tpu_custom_call.1
= control target key start
LH: loop header
LB: loop body
LE: loop exit
PB: predicated region body
PF: predicated region fallthrough
CT: control target
= control target key end

     0   :  { %s732_s0 = inlined_call_operand.vmem [shape: f32[1,4,1,1], index: 0, kind: input, shape index: {}]   ;;  %s733_s1 = inlined_call_operand.<no memory space> [shape: f32[1], index: 1, kind: input, shape index: {}]   ;;  %s734_s2 = inlined_call_operand.hbm [shape: f32[2,4,2,128], index: 2, kind: input, shape index: {}]   ;;  %s735_s3 = inlined_call_operand.hbm [shape: f32[2,2,128], index: 3, kind: output, shape index: {}]  }
   0x1   :  { %8 = sst [smem:[#allocation2]] %s733_s1 }
   0x2   :  { %9 = vsyncpa [#allocation4], 0 }
   0x3   :  { %11 = vsyncpa [#allocation4 + $0x1], 0 }
   0x4   :  { %12 = vsyncpa [#allocation5], 0 }
   0x5   :  { %14 = vsyncpa [#allocation5 + $0x1], 0  ;;  %s587_s14 = smov 0   ;;  %s589_s15 = smov 0  }
   0x6   :  { %s591_s16 = smov 0   ;;  %s593_s17 = smov 0  }
   0x7   :  { %s595_s18 = smov 0   ;;  %s597_s19 = smov 0  }
   0x8 LB: > { %s363_s1 = sadd.s32 4294967295, %s557_s19   ;;  %s364_s20 = sadd.s32 4294967294, %s557_s19   ;;  %s557_s19 = sphi %s597_s19, %s20_s19   ;;  %s553_s18 = sphi %s595_s18, %s746_s18   ;;  %s549_s17 = sphi %s593_s17, %s745_s17   ;;  %s545_s16 = sphi %s591_s16, %s744_s16   ;;  %s541_s15 = sphi %s589_s15, %s743_s15   ;;  %s537_s14 = sphi %s587_s14, %s742_s14  }
   0x9   : > { %s32_s21 = sadd.s32 1, %s553_s18  ;;  %s83_s22 = sadd.s32 1, %s545_s16 }
   0xa   : > { %p34_p0 = scmp.ge.s32.totalorder %s32_s21, 2  ;;  %p90_p1 = scmp.ne.s32.totalorder %s545_s16, %s541_s15 }
   0xb   : > { %p91_p2 = scmp.eq.s32.totalorder %s557_s19, 0  ;;  %p96_p3 = scmp.ne.s32.totalorder %s541_s15, %s537_s14 }
   0xc   : > { %s748_s21 = smov (%p34_p0, %s32_s21), 0  ;;  %p97_p5 = scmp.eq.s32.totalorder %s363_s1, 0 }
   0xd   : > { %p628_p4 = por %p91_p2, %p90_p1  ;;  %s78_s24 = ssub.s32 %s553_s18, %s748_s21 }
   0xe   : > { %p122_p6 = scmp.eq.s32.totalorder %s363_s1, 1  ;;  %p81_p7 = scmp.eq.s32.totalorder %s78_s24, 0 }
   0xf   : > { %p634_p8 = por %p97_p5, %p96_p3  ;;  %p128_p10 = scmp.eq.s32.totalorder %s364_s20, 1 }
  0x10   : > { %p638_p9 = por %p122_p6, %p90_p1  ;;  %p394_p13 = scmp.lt.s32.totalorder %s557_s19, 2 }
  0x11   : > { %s643_s27 = scalar_select %p81_p7, %s545_s16, %s83_s22  }
  0x12   : > { %p645_p11 = por %p128_p10, %p96_p3  ;;  %s154_s29 = sand.u32 1, %s545_s16  }
  0x13   : > { %s367_s30 = sshll.u32 %s154_s29, 3  ;;  %s381_s4 = sshll.u32 %s553_s18, 7 }
  0x14   : > { %s165_s7 = scalar_lea.hbm %s734_s2, %s381_s4  ;;  %s158_s8 = scalar_lea.vmem [#allocation3], %s367_s30 }
  0x15   : > { %s166_s9 = sshll.u32 %s158_s8, 4  ;;  %p658_p0 = pnand %p394_p13, %p628_p4  ;;  %s167_s9 = int_to_ptr.vmem [resolvable:$true] %s166_s9 }
  0x16   : > { %p370_p1 = scmp.ge.s32.totalorder %s557_s19, 1  ;;  %s155_s11 = scalar_lea.sflag [#allocation4], %s154_s29 }
  0x17   : > { %p451_p2 = pneg %p658_p0  ;;  %s462_s12 = scalar_lea.vmem %s167_s9, 128 }
  0x18   : > { %p463_p3 = scmp.ne.s32.totalorder %s167_s9, %s462_s12  ;;  %s559_s13 = smov [#allocation3]  }
  0x19   : > { %s467_s1 = sshll.u32 %s559_s13, 4  ;;  %s468_s1 = int_to_ptr.vmem [resolvable:$false] %s467_s1 }
  0x1a   : > { %p465_p5 = pnand %p463_p3, %p451_p2  ;;  %s469_s20 = scalar_lea.vmem %s468_s1, 256 }
  0x1b   : > { %p470_p7 = scmp.lt.s32.totalorder %s167_s9, %s468_s1  ;;  %p471_p10 = scmp.lt.s32.totalorder %s469_s20, %s462_s12 }
  0x1c   : > { %p466_p6 = pneg %p465_p5 }
  0x1d   : > { %p472_p12 = por %p471_p10, %p470_p7 }
  0x1f   : > { %p473_p4 = pnand %p472_p12, %p466_p6 }
  0x21   : > { %476 = shalt.err (!%p473_p4)
}
  0x22   : > { %s560_s22 = smov 32   ;;  %s561_s23 = smov 2  }
  0x23   : > { %389 = dma.hbm_to_vmem [thread:$0]  (!%p658_p0), %s165_s7, 128, %s167_s9, %s155_s11, %s560_s22, %s560_s22, %s561_s23  }
  0x24   : > { %p174_p13 = scmp.lt.s32.totalorder %s557_s19, 3 }
  0x26   : > { %p175_p2 = pnand %p370_p1, %p174_p13 }
  0x27   : > { %s671_s24 = sand.u32 (!%p175_p2), 1, %s541_s15  }
  0x28   : > { %178 = sbr.rel (%p175_p2) target bundleno = 200 (0xc8), region = 32  ;;  %s371_s29 = sshll.u32 (!%p175_p2), %s671_s24, 3 }
  0x29   : > { %s181_s30 = scalar_lea.sflag (!%p175_p2), [#allocation4], %s671_s24  ;;  %s184_s4 = scalar_lea.vmem (!%p175_p2), [#allocation3], %s371_s29 }
  0x2d   : > { %528 = dma.done.wait (%p634_p8), %s181_s30, 128  }
  0x2e   : > { %530 = vsyncadd (%p634_p8), %s181_s30, 4294967168  ;;  %v562_v0 = vmov 0   ;;  %v375_v1 = vld [vmem:[%s732_s0 + $0x2] ss:$0 sm:$0xff]  ;;  %v373_v2 = vld [vmem:[%s732_s0] ss:$0 sm:$0xff] }
  0x2f   : > { %448 = vset.pattern.permute.xlu1 %v562_v0  ;;  %447 = vset.pattern.permute.xlu0 %v562_v0  ;;  %v376_v3 = vld [vmem:[%s732_s0 + $0x3] ss:$0 sm:$0xff]  ;;  %v374_v4 = vld [vmem:[%s732_s0 + $0x1] ss:$0 sm:$0xff]  ;;  %v209_v8 = vld [vmem:[%s184_s4 + $0x4] sm:$0x3] }
  0x30   : > { %244 = vperm.xlu1 %448, %v375_v1   ;;  %236 = vperm.xlu0 %447, %v373_v2   ;;  %v207_v7 = vld [vmem:[%s184_s4] sm:$0x3]  ;;  %v208_v9 = vld [vmem:[%s184_s4 + $0x2] sm:$0x3]  ;;  %s263_s12 = sld [smem:[#allocation2]]  ;;  %vm255_vm0 = vcmask 1041408  }
  0x31   : > { %v210_v12 = vld [vmem:[%s184_s4 + $0x6] sm:$0x3]  ;;  %s372_s13 = sshll.u32 %s671_s24, 1  ;;  %s378_s1 = sshll.u32 %s549_s17, 5 }
  0x32   : > { %s206_s20 = scalar_lea.vmem [#allocation6], %s372_s13  ;;  %s280_s30 = scalar_lea.hbm %s735_s3, %s378_s1 }
  0x33   : > { %s282_s22 = sshll.u32 %s206_s20, 4  ;;  %s268_s4 = scalar_lea.sflag [#allocation5], %s671_s24  ;;  %s283_s22 = int_to_ptr.vmem [resolvable:$true] %s282_s22 }
  0x34   : > { %248 = vperm.xlu1 %448, %v376_v3   ;;  %240 = vperm.xlu0 %447, %v374_v4   ;;  %s477_s5 = scalar_lea.vmem %s283_s22, 32  ;;  %s563_s6 = smov [#allocation6]  }
  0x35   : > { %p478_p8 = scmp.ne.s32.totalorder %s283_s22, %s477_s5  ;;  %s481_s7 = sshll.u32 %s563_s6, 4  ;;  %s482_s7 = int_to_ptr.vmem [resolvable:$false] %s481_s7 }
  0x36   : > { %v264_v23 = vstv %s263_s12  ;;  %s483_s17 = scalar_lea.vmem %s482_s7, 64  ;;  %p484_p1 = scmp.lt.s32.totalorder %s283_s22, %s482_s7 }
  0x37   : > { %p479_p12 = pnand %p478_p8, %p638_p9  ;;  %p485_p3 = scmp.lt.s32.totalorder %s483_s17, %s477_s5 }
  0x39   : > { %p480_p0 = pneg %p479_p12  ;;  %p486_p5 = por %p485_p3, %p484_p1 }
  0x3b   : > { %p487_p6 = pnand %p486_p5, %p480_p0 }
  0xab   : > { %v245_v5 = vpop.permute.xlu1 %244  ;;  %v237_v6 = vpop.permute.xlu0 %236 }
  0xac   : > { %v251_v10 = vmul.f32 %v237_v6, %v207_v7  ;;  %v253_v14 = vmul.f32 %v245_v5, %v209_v8 }
  0xae   : > { %v256_v16 = vsel %vm255_vm0, %v251_v10, 0.0  ;;  %v259_v20 = vsel %vm255_vm0, %v253_v14, 0.0 }
  0xaf   : > { %v249_v11 = vpop.permute.xlu1 %248  ;;  %v241_v13 = vpop.permute.xlu0 %240 }
  0xb0   : > { %v252_v15 = vmul.f32 %v241_v13, %v208_v9  ;;  %v254_v17 = vmul.f32 %v249_v11, %v210_v12 }
  0xb2   : > { %v257_v18 = vsel %vm255_vm0, %v252_v15, 0.0  ;;  %v261_v22 = vsel %vm255_vm0, %v254_v17, 0.0 }
  0xb3   : > { %v258_v19 = vadd.f32 %v257_v18, %v256_v16 }
  0xb5   : > { %v260_v21 = vadd.f32 %v259_v20, %v258_v19 }
  0xb7   : > { %v262_v24 = vadd.f32 %v261_v22, %v260_v21 }
  0xb9   : > { %v265_v25 = vadd.f32 %v264_v23, %v262_v24 }
  0xbb   : > { %266 = vst [vmem:[%s206_s20] sm:$0x3] %v265_v25 }
  0xbc   : > { %490 = shalt.err (!%p487_p6)
}
  0xbd   : > { %s491_s8 = scalar_lea.hbm %s280_s30, 32  ;;  %s495_s10 = scalar_lea.hbm %s735_s3, 64 }
  0xbe   : > { %p492_p7 = scmp.ne.s32.totalorder %s280_s30, %s491_s8  ;;  %p496_p13 = scmp.lt.s32.totalorder %s280_s30, %s735_s3 }
  0xbf   : > { %p497_p2 = scmp.lt.s32.totalorder %s495_s10, %s491_s8 }
  0xc0   : > { %p493_p10 = pnand %p492_p7, %p638_p9 }
  0xc1   : > { %p498_p8 = por %p497_p2, %p496_p13 }
  0xc2   : > { %p494_p4 = pneg %p493_p10 }
  0xc4   : > { %p499_p12 = pnand %p498_p8, %p494_p4 }
  0xc6   : > { %502 = shalt.err (!%p499_p12)
}
  0xc7   : > { %384 = dma.vmem_to_hbm [thread:$0]  (%p638_p9), %s283_s22, 32, %s280_s30, %s268_s4  }
  0xc8 PF: > { %s294_s12 = sand.u32 1, %s537_s14   ;;  %p741_p0 = scmp.ge.s32.totalorder %s557_s19, 2 }
  0xc9   : > { %s295_s13 = scalar_lea.sflag [#allocation5], %s294_s12 }
  0xca   : > { %p391_p1 = pnand %p741_p0, %p645_p11 }
  0xcc   : > { %p392_p3 = pneg %p391_p1 }
  0xce   : > { %532 = dma.done.wait (%p392_p3), %s295_s13, 32  }
  0xcf   : > { %534 = vsyncadd (%p392_p3), %s295_s13, 4294967264  ;;  %s20_s19 = sadd.s32 1, %s557_s19   ;;  %s742_s14 = smov %s541_s15 }
  0xd0   : > { %p17_p5 = scmp.ge.s32.totalorder %s20_s19, 4   ;;  %s743_s15 = smov %s545_s16 }
  0xd1   : > { %s744_s16 = smov %s643_s27  ;;  %s745_s17 = smov %s553_s18 }
  0xd2   : > { %s746_s18 = smov %s748_s21  ;;  %19 = sbr.rel (!%p17_p5) target bundleno = 8 (0x8), region = 77 }
  0xd7   :  { %300 = vsyncpa [#allocation4], 1 }
  0xd8   :  { %302 = vsyncpa [#allocation4 + $0x1], 1 }
  0xd9   :  { %303 = vsyncpa [#allocation5], 1 }
  0xda   :  { %305 = vsyncpa [#allocation5 + $0x1], 1 }

</bundles_post_ra>
